<compile_context>
chip_gen: v5e
topology: v5e:2x2
jax: 0.10.0
libtpu: 0.0.40
codegen_flags: <defaults>
</compile_context>

<pallas_src>
import functools
import sys

import jax
import jax.numpy as jnp
from jax.experimental import pallas as pl
from jax.experimental.pallas import tpu as pltpu

_EPS = sys.float_info.epsilon          # same constant the torch module uses
_LANE = 128
_MAX_TK = 4096                         # max lanes per reduction step
_MAX_TILE_ELEMS = 4 * 1024 * 1024      # per-buffer tile cap (code-size / unroll)


def _round_up(a, m):
    return (a + m - 1) // m * m


def _cdiv(a, b):
    return (a + b - 1) // b


def _vmem_budgets():
    """Return (input-tile budget incl. double-buffering, vmem_limit_bytes)."""
    cap = None
    try:
        cap = getattr(pltpu.get_tpu_info(), "vmem_capacity_bytes", None)
    except Exception:
        cap = None
    if cap is None:
        cap = 64 * 1024 * 1024                      # assume smallest (v7x-like)
    if cap >= 96 * 1024 * 1024:                     # v5e / v6e: 128 MiB VMEM
        return 64 * 1024 * 1024, 96 * 1024 * 1024
    # v7x: 64 MiB per TensorCore -> stay well under it (both TCs run blocks).
    return 36 * 1024 * 1024, 48 * 1024 * 1024


def _stochastic_pool_kernel(x_ref, o_ref, sx_ref, sxx_ref, *,
                            denom_bias, hw, tk, mask_tail):
    k = pl.program_id(1)

    @pl.when(k == 0)
    def _():
        sx_ref[...] = jnp.zeros_like(sx_ref)
        sxx_ref[...] = jnp.zeros_like(sxx_ref)

    x = x_ref[...].astype(jnp.float32)
    if mask_tail:
        # Only the last reduction step has lanes past hw; for earlier steps the
        # predicate is uniformly true. Select-to-zero keeps garbage (even NaN)
        # out of the running sums. Pure VPU work, hidden at the HBM roofline.
        col = k * tk + jax.lax.broadcasted_iota(jnp.int32, x.shape, 1)
        x = jnp.where(col < hw, x, 0.0)

    sx_ref[...] += jnp.sum(x, axis=-1, keepdims=True)
    sxx_ref[...] += jnp.sum(x * x, axis=-1, keepdims=True)

    @pl.when(k == pl.num_programs(1) - 1)
    def _():
        o_ref[...] = (sxx_ref[...] / (sx_ref[...] + denom_bias)).astype(o_ref.dtype)


def global_stochastic_pool2d(x):
    """x: (B, C, H, W) -> (B, C). Eval-mode GlobalStochasticPool2d."""
    # TODO(synk): training-mode path (multinomial sampling of one spatial index
    # per channel + one-hot scatter) is not implemented; this is the
    # deterministic inference branch.
    b, c, h, w = x.shape
    hw = h * w
    bc = b * c
    x2d = x.reshape(bc, hw)                         # free for contiguous NCHW

    itemsize = jnp.dtype(x.dtype).itemsize
    sub = {4: 8, 2: 16, 1: 32}.get(itemsize, 8)     # dtype-aware sublane quantum

    # ---- HW (lane) axis: never pad in HBM.
    if hw <= _MAX_TK:
        tk = hw                                     # full-dim block: exempt from 128 rule
        k_steps = 1
        mask_tail = False
    else:
        n = _cdiv(hw, _MAX_TK)
        tk = _round_up(_cdiv(hw, n), _LANE)         # 128-aligned, near-even split
        k_steps = _cdiv(hw, tk)
        mask_tail = (hw % tk) != 0

    tk_vmem = _round_up(tk, _LANE)                  # lanes the VMEM tile really occupies

    # ---- BC (sublane) axis: rows per tile from the real VMEM footprint.
    in_budget, vmem_limit = _vmem_budgets()
    row_bytes = (2 * tk_vmem * itemsize             # double-buffered input tile
                 + 2 * _LANE * 4                    # sx / sxx f32 scratch (lane-padded)
                 + 2 * _LANE * itemsize)            # double-buffered (tr,1) out block
    tr_budget = max(sub, (in_budget // row_bytes) // sub * sub)
    tr_budget = min(tr_budget,
                    max(sub, (_MAX_TILE_ELEMS // tk_vmem) // sub * sub))

    if bc <= sub:
        tr = bc                                     # single block; full-dim exempt
    elif bc <= tr_budget:
        # Whole problem fits: split rows into >=2 blocks so the pipeline (and
        # both v7x TensorCores on the "parallel" axis) have work.
        tr = min(tr_budget, max(sub, _round_up(_cdiv(bc, 2), sub)))
    else:
        tr = tr_budget
    n_row_blocks = _cdiv(bc, tr)                    # last block may run past bc;
                                                    # OOB out-rows are discarded.

    grid = (n_row_blocks, k_steps)

    kernel = functools.partial(
        _stochastic_pool_kernel,
        denom_bias=float(hw) * _EPS, hw=hw, tk=tk, mask_tail=mask_tail)

    cost = pl.CostEstimate(
        flops=3 * bc * hw,
        transcendentals=0,
        bytes_accessed=bc * hw * itemsize + bc * itemsize)

    out = pl.pallas_call(
        kernel,
        out_shape=jax.ShapeDtypeStruct((bc, 1), x.dtype),
        grid_spec=pltpu.PrefetchScalarGridSpec(
            num_scalar_prefetch=0,
            grid=grid,
            in_specs=[pl.BlockSpec((tr, tk), lambda i, k: (i, k))],
            out_specs=pl.BlockSpec((tr, 1), lambda i, k: (i, 0)),
            scratch_shapes=[pltpu.VMEM((tr, 1), jnp.float32),
                            pltpu.VMEM((tr, 1), jnp.float32)],
        ),
        compiler_params=pltpu.CompilerParams(
            dimension_semantics=("parallel", "arbitrary"),
            vmem_limit_bytes=vmem_limit,
        ),
        cost_estimate=cost,
    )(x2d)

    return out[:, 0].reshape(b, c)


if __name__ == "__main__":
    key = jax.random.PRNGKey(0)
    b, c, h, w = 2, 4, 16, 16
    # Stochastic pooling is normally applied to non-negative activations;
    # uniform [0,1) keeps the normalization well-conditioned.
    x = jax.random.uniform(key, (b, c, h, w), dtype=jnp.float32)

    y = global_stochastic_pool2d(x)
    y = jax.block_until_ready(y)

    # Pure-JAX reference with the same semantics as the PyTorch eval branch.
    data = x.reshape(b * c, h * w)
    prob = data / (data + _EPS).sum(-1, keepdims=True)
    y_ref = (x * prob.reshape(b, c, h, w)).sum(axis=(-1, -2))

    assert y.shape == (b, c)
    assert jnp.allclose(y, y_ref, atol=1e-5, rtol=1e-5)

    print("KERNEL_OK")
</pallas_src>

<mosaic_0001>
module attributes {stable_mosaic.version = 11 : i64} {
  func.func @_stochastic_pool_kernel(%arg0: i32, %arg1: i32, %arg2: memref<8x256xf32, #tpu.memory_space<vmem>>, %arg3: memref<8x1xf32, #tpu.memory_space<vmem>>, %arg4: memref<8x1xf32, #tpu.memory_space<vmem>>, %arg5: memref<8x1xf32, #tpu.memory_space<vmem>>) attributes {dimension_semantics = [#tpu.dimension_semantics<parallel>, #tpu.dimension_semantics<arbitrary>], iteration_bounds = array<i64: 1, 1>, scalar_prefetch = 0 : i64, scratch_operands = 2 : i64, tpu.core_type = #tpu.core_type<tc>, window_params = [{transform_indices = @transform_0, window_bounds = array<i64: 8, 256>}, {transform_indices = @transform_1, window_bounds = array<i64: 8, 1>}]} {
    %c0_i32 = arith.constant 0 : i32
    %0 = arith.cmpi eq, %arg1, %c0_i32 : i32
    %1 = arith.extui %0 : i1 to i32
    %c0_i32_0 = arith.constant 0 : i32
    %2 = arith.cmpi ne, %1, %c0_i32_0 : i32
    scf.if %2 {
      %cst_13 = arith.constant 0.000000e+00 : f32
      %18 = vector.broadcast %cst_13 : f32 to vector<8x1xf32>
      %c0_14 = arith.constant 0 : index
      %c0_15 = arith.constant 0 : index
      %19 = vector.load %arg4[%c0_14, %c0_15] : memref<8x1xf32, #tpu.memory_space<vmem>>, vector<8x1xf32>
      tpu.vector_store %arg4[%c0_14, %c0_15], %18 {strides = array<i32>} : memref<8x1xf32, #tpu.memory_space<vmem>>, vector<8x1xf32>,
      %cst_16 = arith.constant 0.000000e+00 : f32
      %20 = vector.broadcast %cst_16 : f32 to vector<8x1xf32>
      %c0_17 = arith.constant 0 : index
      %c0_18 = arith.constant 0 : index
      %21 = vector.load %arg5[%c0_17, %c0_18] : memref<8x1xf32, #tpu.memory_space<vmem>>, vector<8x1xf32>
      tpu.vector_store %arg5[%c0_17, %c0_18], %20 {strides = array<i32>} : memref<8x1xf32, #tpu.memory_space<vmem>>, vector<8x1xf32>,
    } else {
    }
    %c0 = arith.constant 0 : index
    %c0_1 = arith.constant 0 : index
    %3 = vector.load %arg2[%c0, %c0_1] : memref<8x256xf32, #tpu.memory_space<vmem>>, vector<8x256xf32>
    %c0_2 = arith.constant 0 : index
    %c0_3 = arith.constant 0 : index
    %4 = vector.load %arg4[%c0_2, %c0_3] : memref<8x1xf32, #tpu.memory_space<vmem>>, vector<8x1xf32>
    %cst = arith.constant dense<0.000000e+00> : vector<8xf32>
    %5 = vector.multi_reduction <add>, %3, %cst [1] : vector<8x256xf32> to vector<8xf32>
    %6 = vector.shape_cast %5 : vector<8xf32> to vector<8x1xf32>
    %7 = arith.addf %4, %6 : vector<8x1xf32>
    %c0_4 = arith.constant 0 : index
    %c0_5 = arith.constant 0 : index
    %8 = vector.load %arg4[%c0_4, %c0_5] : memref<8x1xf32, #tpu.memory_space<vmem>>, vector<8x1xf32>
    tpu.vector_store %arg4[%c0_4, %c0_5], %7 {strides = array<i32>} : memref<8x1xf32, #tpu.memory_space<vmem>>, vector<8x1xf32>,
    %c0_6 = arith.constant 0 : index
    %c0_7 = arith.constant 0 : index
    %9 = vector.load %arg5[%c0_6, %c0_7] : memref<8x1xf32, #tpu.memory_space<vmem>>, vector<8x1xf32>
    %10 = arith.mulf %3, %3 : vector<8x256xf32>
    %cst_8 = arith.constant dense<0.000000e+00> : vector<8xf32>
    %11 = vector.multi_reduction <add>, %10, %cst_8 [1] : vector<8x256xf32> to vector<8xf32>
    %12 = vector.shape_cast %11 : vector<8xf32> to vector<8x1xf32>
    %13 = arith.addf %9, %12 : vector<8x1xf32>
    %c0_9 = arith.constant 0 : index
    %c0_10 = arith.constant 0 : index
    %14 = vector.load %arg5[%c0_9, %c0_10] : memref<8x1xf32, #tpu.memory_space<vmem>>, vector<8x1xf32>
    tpu.vector_store %arg5[%c0_9, %c0_10], %13 {strides = array<i32>} : memref<8x1xf32, #tpu.memory_space<vmem>>, vector<8x1xf32>,
    %c0_i32_11 = arith.constant 0 : i32
    %15 = arith.cmpi eq, %arg1, %c0_i32_11 : i32
    %16 = arith.extui %15 : i1 to i32
    %c0_i32_12 = arith.constant 0 : i32
    %17 = arith.cmpi ne, %16, %c0_i32_12 : i32
    scf.if %17 {
      %c0_13 = arith.constant 0 : index
      %c0_14 = arith.constant 0 : index
      %18 = vector.load %arg5[%c0_13, %c0_14] : memref<8x1xf32, #tpu.memory_space<vmem>>, vector<8x1xf32>
      %c0_15 = arith.constant 0 : index
      %c0_16 = arith.constant 0 : index
      %19 = vector.load %arg4[%c0_15, %c0_16] : memref<8x1xf32, #tpu.memory_space<vmem>>, vector<8x1xf32>
      %cst_17 = arith.constant 5.68434189E-14 : f32
      %20 = vector.broadcast %cst_17 : f32 to vector<8x1xf32>
      %21 = arith.addf %19, %20 : vector<8x1xf32>
      %22 = arith.divf %18, %21 : vector<8x1xf32>
      %c0_18 = arith.constant 0 : index
      %c0_19 = arith.constant 0 : index
      %23 = vector.load %arg3[%c0_18, %c0_19] : memref<8x1xf32, #tpu.memory_space<vmem>>, vector<8x1xf32>
      tpu.vector_store %arg3[%c0_18, %c0_19], %22 {strides = array<i32>} : memref<8x1xf32, #tpu.memory_space<vmem>>, vector<8x1xf32>,
    } else {
    }
    return
  }
  func.func @transform_0(%arg0: i32, %arg1: i32) -> (i32, i32) {
    %c0_i32 = arith.constant 0 : i32
    return %arg0, %arg1 : i32, i32
  }
  func.func @transform_1(%arg0: i32, %arg1: i32) -> (i32, i32) {
    %c0_i32 = arith.constant 0 : i32
    %c0_i32_0 = arith.constant 0 : i32
    return %arg0, %c0_i32 : i32, i32
  }
}

</mosaic_0001>

<bundles_post_ra>
// kernel: tpu_custom_call.1
= control target key start
LH: loop header
LB: loop body
LE: loop exit
PB: predicated region body
PF: predicated region fallthrough
CT: control target
= control target key end

     0   :  { %6 = vsyncpa [#allocation5], 0  ;;  %s103_s9 = smov [#allocation4]   ;;  %s126_s0 = inlined_call_operand.hbm [shape: f32[8,256], index: 0, kind: input, shape index: {}]   ;;  %s127_s1 = inlined_call_operand.vmem [shape: f32[8,1], index: 1, kind: output, shape index: {}]  }
   0x1   :  { %s12_s8 = sshll.u32 %s126_s0, 4  ;;  %s14_s10 = sshll.u32 %s103_s9, 4  ;;  %s13_s8 = int_to_ptr.hbm [resolvable:$true] %s12_s8  ;;  %s15_s10 = int_to_ptr.vmem [resolvable:$true] %s14_s10 }
   0x2   :  { %17 = dma.hbm_to_vmem [thread:$0]  %s13_s8, 256, %s15_s10, [#allocation5]  }
   0x3   :  { %101 = dma.done.wait [#allocation5], 256  }
   0x4   :  { %102 = vsyncadd [#allocation5], 4294967040  ;;  %vm26_vm0 = vcmask 7168   ;;  %v104_v0 = vmov 0.0   ;;  %v29_v1 = vld [vmem:[#allocation4] sm:$0xff]  ;;  %v30_v2 = vld [vmem:[#allocation4 + $0x8] sm:$0xff] }
   0x5   :  { %27 = vst.msk [vmem:[#allocation2] sm:$0xff] %vm26_vm0, %v104_v0  ;;  %v32_v3 = vadd.f32 %v30_v2, %v29_v1  ;;  %v39_v4 = vmul.f32 %v29_v1, %v29_v1  ;;  %v40_v5 = vmul.f32 %v30_v2, %v30_v2 }
   0x6   :  { %28 = vst.msk [vmem:[#allocation3] sm:$0xff] %vm26_vm0, %v104_v0 }
   0x7   :  { %33 = vadd.xlane.f32.xlu0 %v32_v3  ;;  %v41_v6 = vadd.f32 %v40_v5, %v39_v4 }
   0xc   :  { %v31_v7 = vld [vmem:[#allocation2] sm:$0xff] }
   0xd   :  { %v38_v10 = vld [vmem:[#allocation3] sm:$0xff] }
   0xf   :  { %42 = vadd.xlane.f32.xlu0 %v41_v6 }
  0x7a   :  { %v34_v8 = vpop.xlane.xlu0 %33 }
  0x7b   :  { %v35_v9 = vadd.f32 %v34_v8, %v31_v7 }
  0x7d   :  { %37 = vst.msk [vmem:[#allocation2] sm:$0xff] %vm26_vm0, %v35_v9 }
  0x82   :  { %v43_v11 = vpop.xlane.xlu0 %42 }
  0x83   :  { %v44_v12 = vadd.f32 %v43_v11, %v38_v10 }
  0x84   :  { %v50_v13 = vld [vmem:[#allocation2] sm:$0xff] }
  0x85   :  { %v51_v14 = vadd.f32 5.684342e-14, %v50_v13  ;;  %45 = vst.msk [vmem:[#allocation3] sm:$0xff] %vm26_vm0, %v44_v12 }
  0x87   :  { %75 = vrcp.f32 %v51_v14  ;;  %v63_v18 = vand.u32 2147483648, %v51_v14  ;;  %v61_v20 = vand.u32 2147483647, %v51_v14  ;;  %vm57_vm2 = vweird.f32 %v51_v14 }
  0x89   :  { %v64_v23 = vor.u32 1.1754944e-38, %v63_v18  ;;  %vm62_vm4 = vcmp.eq.f32.partialorder %v61_v20, 8.507059e+37 }
  0x8c   :  { %v49_v22 = vld [vmem:[#allocation3] sm:$0xff] }
  0x8d   :  { %v76_v15 = vpop.eup %75 }
  0x8e   :  { %v53_v16 = vmul.f32 %v76_v15, %v51_v14  ;;  %vm58_vm1 = vweird.f32 %v76_v15 }
  0x8f   :  { %vm59_vm3 = vmor %vm57_vm2, %vm58_vm1 }
  0x90   :  { %v54_v17 = vsub.f32 1.0, %v53_v16 }
  0x92   :  { %v55_v19 = vmul.f32 %v76_v15, %v54_v17 }
  0x94   :  { %v56_v21 = vadd.f32 %v76_v15, %v55_v19 }
  0x96   :  { %v60_v24 = vsel %vm59_vm3, %v76_v15, %v56_v21 }
  0x97   :  { %v65_v25 = vsel %vm62_vm4, %v64_v23, %v60_v24 }
  0x98   :  { %v66_v26 = vmul.f32 %v65_v25, %v49_v22 }
  0x9a   :  { %67 = vst.msk [vmem:[%s127_s1] sm:$0xff] %vm26_vm0, %v66_v26 }
  0x9b   :  { %72 = vsyncpa [#allocation5], 1 }

</bundles_post_ra>
